<compile_context>
chip_gen: v7x
topology: tpu7x:2x2x1
jax: 0.10.0
libtpu: 0.0.40
codegen_flags: <defaults>
</compile_context>

<pallas_src>
import functools

import jax
import jax.numpy as jnp
from jax import lax
from jax.experimental import pallas as pl
from jax.experimental.pallas import tpu as pltpu


# ----------------------------------------------------------------------------
# Helpers
# ----------------------------------------------------------------------------
def _round_up(n, m):
    return ((n + m - 1) // m) * m


def _pack_heads(w_heads, b_heads, d_pad=None):
    """[H,D,C] -> bf16 [Dp, Np] (zero-padded to 128 lanes / Dp rows), f32 [1,Np]."""
    H, D, C = w_heads.shape
    HC = H * C
    Np = _round_up(HC, 128)
    Dp = D if d_pad is None else d_pad
    w_flat = jnp.transpose(w_heads, (1, 0, 2)).reshape(D, HC)
    w_pad = jnp.zeros((Dp, Np), jnp.float32).at[:D, :HC].set(w_flat)
    b_pad = jnp.zeros((Np,), jnp.float32).at[:HC].set(b_heads.reshape(HC))
    return w_pad.astype(jnp.bfloat16), b_pad.reshape(1, Np), HC, Np


# ----------------------------------------------------------------------------
# Fused kernel: conv-GEMM + ReLU + global-avg-pool + fc + heads (per B tile)
# ----------------------------------------------------------------------------
def _make_fused_kernel(b_tile, hw):
    inv_hw = 1.0 / float(hw)

    def kernel(p_ref, wc_ref, bc_ref, wf_ref, bf_ref, wh_ref, bh_ref,
               feat_ref, heads_ref):
        # (1) conv-as-GEMM + bias + ReLU over this tile's b_tile*hw patch rows
        #     (bf16 operands, f32 accumulation on the MXU).
        conv = jnp.dot(p_ref[...], wc_ref[...],
                       preferred_element_type=jnp.float32)
        conv = jnp.maximum(conv + bc_ref[...], 0.0)          # [b_tile*hw, Cc]

        # (2) per-image global average pool as a block-diagonal GEMM.  The
        #     0/1 selector is generated in-register from iotas; this keeps
        #     everything 2-D GEMM/VPU work (no cross-sublane reduction or
        #     sublane concat) and the fc/heads GEMMs at M=b_tile.
        rows = lax.broadcasted_iota(jnp.int32, (b_tile, b_tile * hw), 1)
        imgs = lax.broadcasted_iota(jnp.int32, (b_tile, b_tile * hw), 0)
        lo = imgs * hw
        pool = jnp.where((rows >= lo) & (rows < lo + hw),
                         jnp.float32(inv_hw), jnp.float32(0.0))
        pooled = jnp.dot(pool, conv,
                         preferred_element_type=jnp.float32)  # [b_tile, Cc]

        # (3) fc + ReLU -> lane-padded features (columns >= D are exactly 0
        #     because w_fc / b_fc are zero-padded), lane-dense store.
        feats = jnp.dot(pooled.astype(wf_ref.dtype), wf_ref[...],
                        preferred_element_type=jnp.float32) + bf_ref[...]
        feats = jnp.maximum(feats, 0.0)                       # [b_tile, Dp]
        feat_ref[...] = feats.astype(feat_ref.dtype)

        # (4) all cluster heads as one wide lane-padded GEMM, lane-dense store.
        heads = jnp.dot(feats.astype(wh_ref.dtype), wh_ref[...],
                        preferred_element_type=jnp.float32) + bh_ref[...]
        heads_ref[...] = heads.astype(heads_ref.dtype)        # [b_tile, Np]

    return kernel


def fused_forward(x, params, b_tile=None):
    """x: [B, C_in, H, W] -> (features [B, D], head outputs [B, H*C])."""
    B, Cin, H, W = x.shape
    HW = H * W
    Cc = params["w_conv"].shape[1]
    D = params["w_fc"].shape[1]
    Dp = _round_up(D, 128)

    if b_tile is None:
        b_tile = max(1, min(B, 8))       # sweepable; 8-32 recommended for big B
    Bp = _round_up(B, b_tile)
    grid_b = Bp // b_tile

    # im2col glue (XLA): [B, Cin*9, H, W] -> flat [B*HW, K] bf16 patch rows.
    # TODO(synk): fold this im2col into the kernel as 9 shifted GEMMs to avoid
    # the 9x-expanded patches tensor in HBM at large H/W/B.
    patches = lax.conv_general_dilated_patches(
        x, filter_shape=(3, 3), window_strides=(1, 1), padding="SAME")
    K = patches.shape[1]
    p2 = patches.transpose(0, 2, 3, 1).reshape(B * HW, K).astype(jnp.bfloat16)
    if Bp != B:
        p2 = jnp.pad(p2, ((0, (Bp - B) * HW), (0, 0)))

    wc = params["w_conv"].astype(jnp.bfloat16)                       # [K, Cc]
    bc = params["b_conv"].reshape(1, Cc).astype(jnp.float32)
    wf = (jnp.zeros((Cc, Dp), jnp.float32)
          .at[:, :D].set(params["w_fc"]).astype(jnp.bfloat16))       # [Cc, Dp]
    bf = jnp.zeros((1, Dp), jnp.float32).at[:, :D].set(
        params["b_fc"].reshape(1, D))
    wh_pad, bh_pad, HC, Np = _pack_heads(params["w_heads"],
                                         params["b_heads"], d_pad=Dp)

    kernel = _make_fused_kernel(b_tile, HW)

    # Advisory cost estimate for XLA scheduling around the custom call.
    flops = int(2 * Bp * HW * K * Cc            # conv GEMM
                + 2 * Bp * b_tile * HW * Cc     # pooling GEMM
                + 2 * Bp * Cc * Dp              # fc
                + 2 * Bp * Dp * Np)             # heads
    bytes_accessed = int(p2.size * 2
                         + grid_b * (wc.size * 2 + wf.size * 2 + wh_pad.size * 2
                                     + (Cc + Dp + Np) * 4)
                         + Bp * (Dp + Np) * 4)

    # Per-step VMEM (double-buffered operands/outputs + f32 intermediates),
    # with generous headroom; explicit so larger B_tile/D/Np can't silently
    # overshoot v7x's smaller scoped-VMEM budget.
    step_bytes = (2 * (b_tile * HW * K * 2                 # patches block
                       + K * Cc * 2 + Cc * Dp * 2 + Dp * Np * 2   # weights
                       + (Cc + Dp + Np) * 4                # biases
                       + b_tile * (Dp + Np) * 4)           # output blocks
                  + b_tile * HW * 128 * 4                  # conv f32 spill slab
                  + b_tile * b_tile * HW * 4)              # pooling selector
    vmem_limit = int(min(max(4 * step_bytes, 16 * (1 << 20)), 100 * (1 << 20)))

    feats, heads = pl.pallas_call(
        kernel,
        out_shape=(jax.ShapeDtypeStruct((Bp, Dp), jnp.float32),
                   jax.ShapeDtypeStruct((Bp, Np), jnp.float32)),
        grid_spec=pltpu.PrefetchScalarGridSpec(
            num_scalar_prefetch=0,
            grid=(grid_b,),
            in_specs=[
                pl.BlockSpec((b_tile * HW, K), lambda i: (i, 0)),   # patches
                pl.BlockSpec((K, Cc), lambda i: (0, 0)),            # w_conv
                pl.BlockSpec((1, Cc), lambda i: (0, 0)),            # b_conv
                pl.BlockSpec((Cc, Dp), lambda i: (0, 0)),           # w_fc
                pl.BlockSpec((1, Dp), lambda i: (0, 0)),            # b_fc
                pl.BlockSpec((Dp, Np), lambda i: (0, 0)),           # w_heads
                pl.BlockSpec((1, Np), lambda i: (0, 0)),            # b_heads
            ],
            out_specs=(pl.BlockSpec((b_tile, Dp), lambda i: (i, 0)),
                       pl.BlockSpec((b_tile, Np), lambda i: (i, 0))),
        ),
        compiler_params=pltpu.CompilerParams(
            dimension_semantics=(pltpu.PARALLEL,),   # independent batch tiles
            vmem_limit_bytes=vmem_limit),
        cost_estimate=pl.CostEstimate(flops=flops, transcendentals=0,
                                      bytes_accessed=bytes_accessed),
    )(p2, wc, bc, wf, bf, wh_pad, bh_pad)

    return feats[:B, :D], heads[:B, :HC]


# ----------------------------------------------------------------------------
# forward_pass='head': heads applied to precomputed features
# ----------------------------------------------------------------------------
def _heads_kernel(f_ref, wh_ref, bh_ref, o_ref):
    o_ref[...] = (jnp.dot(f_ref[...], wh_ref[...],
                          preferred_element_type=jnp.float32)
                  + bh_ref[...]).astype(o_ref.dtype)


_HEADS_PALLAS_MIN_B = 1024  # below this a pallas_call costs more than the GEMM


def cluster_heads(features, w_heads, b_heads):
    """features [B,D] -> list of [B, C] per head (one wide packed GEMM)."""
    H, D, C = w_heads.shape
    B = features.shape[0]
    wh_pad, bh_pad, HC, Np = _pack_heads(w_heads, b_heads)

    if B < _HEADS_PALLAS_MIN_B:
        # Tiny GEMM: let XLA fuse it (per perf review) using the same packed
        # bf16 weights.
        out = (jnp.dot(features.astype(jnp.bfloat16), wh_pad,
                       preferred_element_type=jnp.float32) + bh_pad)
    else:
        tb = 256
        Bp = _round_up(B, tb)
        f = jnp.zeros((Bp, D), jnp.bfloat16).at[:B].set(
            features.astype(jnp.bfloat16))
        out = pl.pallas_call(
            _heads_kernel,
            out_shape=jax.ShapeDtypeStruct((Bp, Np), jnp.float32),
            grid=(Bp // tb,),
            in_specs=[pl.BlockSpec((tb, D), lambda i: (i, 0)),
                      pl.BlockSpec((D, Np), lambda i: (0, 0)),
                      pl.BlockSpec((1, Np), lambda i: (0, 0))],
            out_specs=pl.BlockSpec((tb, Np), lambda i: (i, 0)),
            compiler_params=pltpu.CompilerParams(
                dimension_semantics=(pltpu.PARALLEL,)),
        )(f, wh_pad, bh_pad)
        out = out[:B]
    return [out[:, h * C:(h + 1) * C] for h in range(H)]


# ----------------------------------------------------------------------------
# Module-level forward (mirrors ClusteringModel.forward semantics)
# ----------------------------------------------------------------------------
@functools.partial(jax.jit, static_argnames=("forward_pass",))
def clustering_model_forward(x, params, forward_pass="default"):
    H = params["b_heads"].shape[0]
    C = params["b_heads"].shape[1]
    if forward_pass == "default":
        _, heads_flat = fused_forward(x, params)
        return [heads_flat[:, h * C:(h + 1) * C] for h in range(H)]
    elif forward_pass == "backbone":
        feats, _ = fused_forward(x, params)
        return feats
    elif forward_pass == "head":
        return cluster_heads(x, params["w_heads"], params["b_heads"])
    elif forward_pass == "return_all":
        feats, heads_flat = fused_forward(x, params)
        return {"features": feats,
                "output": [heads_flat[:, h * C:(h + 1) * C] for h in range(H)]}
    else:
        raise ValueError("Invalid forward pass {}".format(forward_pass))


# ----------------------------------------------------------------------------
# Deterministic parameter init (synthetic; shapes per module __init__)
# ----------------------------------------------------------------------------
def init_params(key, c_in, c_conv, backbone_dim, nclusters, nheads):
    ks = jax.random.split(key, 6)
    kconv = c_in * 3 * 3

    def u(k, shape, fan_in):
        bound = 1.0 / jnp.sqrt(fan_in)
        return jax.random.uniform(k, shape, jnp.float32, -bound, bound)

    return {
        "w_conv": u(ks[0], (kconv, c_conv), kconv),
        "b_conv": u(ks[1], (c_conv,), kconv),
        "w_fc": u(ks[2], (c_conv, backbone_dim), c_conv),
        "b_fc": u(ks[3], (backbone_dim,), c_conv),
        "w_heads": u(ks[4], (nheads, backbone_dim, nclusters), backbone_dim),
        "b_heads": u(ks[5], (nheads, nclusters), backbone_dim),
    }


# ----------------------------------------------------------------------------
# Pure-JAX f32 reference (for correctness check of the Pallas kernel)
# ----------------------------------------------------------------------------
def reference_forward(x, params):
    B, Cin, H, W = x.shape
    patches = lax.conv_general_dilated_patches(
        x, filter_shape=(3, 3), window_strides=(1, 1), padding="SAME")
    p2 = patches.transpose(0, 2, 3, 1).reshape(B * H * W, -1)
    conv = jnp.maximum(p2 @ params["w_conv"] + params["b_conv"], 0.0)
    pooled = jnp.mean(conv.reshape(B, H * W, -1), axis=1)
    feats = jnp.maximum(pooled @ params["w_fc"] + params["b_fc"], 0.0)
    outs = [feats @ params["w_heads"][h] + params["b_heads"][h]
            for h in range(params["w_heads"].shape[0])]
    return feats, outs


if __name__ == "__main__":
    B, C_in, H, W = 2, 4, 16, 16
    C_conv, backbone_dim, nclusters, nheads = 8, 32, 10, 2

    key = jax.random.PRNGKey(0)
    kx, kp = jax.random.split(key)
    x = jax.random.normal(kx, (B, C_in, H, W), jnp.float32)
    params = init_params(kp, C_in, C_conv, backbone_dim, nclusters, nheads)

    # default forward pass
    out = clustering_model_forward(x, params, forward_pass="default")
    out = jax.block_until_ready(out)

    # backbone-only and return_all forward passes
    feats_bb = clustering_model_forward(x, params, forward_pass="backbone")
    feats_bb = jax.block_until_ready(feats_bb)
    all_out = clustering_model_forward(x, params, forward_pass="return_all")
    all_out = jax.block_until_ready(all_out)

    # head-only forward pass (heads applied to precomputed features)
    head_only = clustering_model_forward(all_out["features"], params,
                                         forward_pass="head")
    head_only = jax.block_until_ready(head_only)

    # correctness check vs. f32 reference (bf16 MXU operands -> loose tol)
    ref_feats, ref_outs = reference_forward(x, params)
    tol = dict(atol=3e-2, rtol=3e-2)
    assert len(out) == nheads
    for h in range(nheads):
        assert out[h].shape == (B, nclusters)
        assert jnp.allclose(out[h], ref_outs[h], **tol)
        assert jnp.allclose(all_out["output"][h], ref_outs[h], **tol)
        assert jnp.allclose(head_only[h], ref_outs[h], **tol)
    assert all_out["features"].shape == (B, backbone_dim)
    assert feats_bb.shape == (B, backbone_dim)
    assert jnp.allclose(all_out["features"], ref_feats, **tol)
    assert jnp.allclose(feats_bb, ref_feats, **tol)

    print("KERNEL_OK")
</pallas_src>

<mosaic_0001>
module attributes {stable_mosaic.version = 11 : i64} {
  func.func @kernel(%arg0: i32, %arg1: memref<512x36xbf16, #tpu.memory_space<vmem>>, %arg2: memref<36x8xbf16, #tpu.memory_space<vmem>>, %arg3: memref<1x8xf32, #tpu.memory_space<vmem>>, %arg4: memref<8x128xbf16, #tpu.memory_space<vmem>>, %arg5: memref<1x128xf32, #tpu.memory_space<vmem>>, %arg6: memref<128x128xbf16, #tpu.memory_space<vmem>>, %arg7: memref<1x128xf32, #tpu.memory_space<vmem>>, %arg8: memref<2x128xf32, #tpu.memory_space<vmem>>, %arg9: memref<2x128xf32, #tpu.memory_space<vmem>>) attributes {dimension_semantics = [#tpu.dimension_semantics<parallel>], iteration_bounds = array<i64: 1>, scalar_prefetch = 0 : i64, scratch_operands = 0 : i64, tpu.core_type = #tpu.core_type<tc>, window_params = [{transform_indices = @transform_0, window_bounds = array<i64: 512, 36>}, {pipeline_mode = #tpu.pipeline_mode<synchronous>, transform_indices = @transform_1, window_bounds = array<i64: 36, 8>}, {pipeline_mode = #tpu.pipeline_mode<synchronous>, transform_indices = @transform_2, window_bounds = array<i64: 1, 8>}, {pipeline_mode = #tpu.pipeline_mode<synchronous>, transform_indices = @transform_3, window_bounds = array<i64: 8, 128>}, {pipeline_mode = #tpu.pipeline_mode<synchronous>, transform_indices = @transform_4, window_bounds = array<i64: 1, 128>}, {pipeline_mode = #tpu.pipeline_mode<synchronous>, transform_indices = @transform_5, window_bounds = array<i64: 128, 128>}, {pipeline_mode = #tpu.pipeline_mode<synchronous>, transform_indices = @transform_6, window_bounds = array<i64: 1, 128>}, {transform_indices = @transform_7, window_bounds = array<i64: 2, 128>}, {transform_indices = @transform_8, window_bounds = array<i64: 2, 128>}]} {
    %c0 = arith.constant 0 : index
    %c0_0 = arith.constant 0 : index
    %0 = vector.load %arg1[%c0, %c0_0] : memref<512x36xbf16, #tpu.memory_space<vmem>>, vector<512x36xbf16>
    %c0_1 = arith.constant 0 : index
    %c0_2 = arith.constant 0 : index
    %1 = vector.load %arg2[%c0_1, %c0_2] : memref<36x8xbf16, #tpu.memory_space<vmem>>, vector<36x8xbf16>
    %cst = arith.constant dense<0.000000e+00> : vector<512x8xf32>
    %2 = tpu.matmul %0, %1, %cst {dimension_numbers = #tpu.dot_dimension_numbers<[1], [0], [0], [1], [0, 0, 1, 1], [], []>} : vector<512x36xbf16>, vector<36x8xbf16>, vector<512x8xf32> -> vector<512x8xf32>
    %c0_3 = arith.constant 0 : index
    %c0_4 = arith.constant 0 : index
    %3 = vector.load %arg3[%c0_3, %c0_4] : memref<1x8xf32, #tpu.memory_space<vmem>>, vector<1x8xf32>
    %4 = vector.broadcast %3 : vector<1x8xf32> to vector<512x8xf32>
    %5 = arith.addf %2, %4 : vector<512x8xf32>
    %cst_5 = arith.constant 0.000000e+00 : f32
    %6 = vector.broadcast %cst_5 : f32 to vector<512x8xf32>
    %7 = arith.maximumf %5, %6 : vector<512x8xf32>
    %8 = tpu.iota {dimensions = array<i32: 1>} : vector<2x512xi32>
    %9 = tpu.iota {dimensions = array<i32: 0>} : vector<2x512xi32>
    %c256_i32 = arith.constant 256 : i32
    %10 = vector.broadcast %c256_i32 : i32 to vector<2x512xi32>
    %11 = arith.muli %9, %10 : vector<2x512xi32>
    %12 = arith.cmpi sge, %8, %11 : vector<2x512xi32>
    %c256_i32_6 = arith.constant 256 : i32
    %13 = vector.broadcast %c256_i32_6 : i32 to vector<2x512xi32>
    %14 = arith.addi %11, %13 : vector<2x512xi32>
    %15 = arith.cmpi slt, %8, %14 : vector<2x512xi32>
    %16 = arith.andi %12, %15 : vector<2x512xi1>
    %cst_7 = arith.constant 3.906250e-03 : f32
    %cst_8 = arith.constant 0.000000e+00 : f32
    %17 = vector.broadcast %cst_7 : f32 to vector<2x512xf32>
    %18 = vector.broadcast %cst_8 : f32 to vector<2x512xf32>
    %19 = arith.select %16, %17, %18 : vector<2x512xi1>, vector<2x512xf32>
    %cst_9 = arith.constant dense<0.000000e+00> : vector<2x8xf32>
    %20 = tpu.matmul %19, %7, %cst_9 {dimension_numbers = #tpu.dot_dimension_numbers<[1], [0], [0], [1], [0, 0, 1, 1], [], []>} : vector<2x512xf32>, vector<512x8xf32>, vector<2x8xf32> -> vector<2x8xf32>
    %21 = arith.truncf %20 : vector<2x8xf32> to vector<2x8xbf16>
    %c0_10 = arith.constant 0 : index
    %c0_11 = arith.constant 0 : index
    %22 = vector.load %arg4[%c0_10, %c0_11] : memref<8x128xbf16, #tpu.memory_space<vmem>>, vector<8x128xbf16>
    %cst_12 = arith.constant dense<0.000000e+00> : vector<2x128xf32>
    %23 = tpu.matmul %21, %22, %cst_12 {dimension_numbers = #tpu.dot_dimension_numbers<[1], [0], [0], [1], [0, 0, 1, 1], [], []>} : vector<2x8xbf16>, vector<8x128xbf16>, vector<2x128xf32> -> vector<2x128xf32>
    %c0_13 = arith.constant 0 : index
    %c0_14 = arith.constant 0 : index
    %24 = vector.load %arg5[%c0_13, %c0_14] : memref<1x128xf32, #tpu.memory_space<vmem>>, vector<1x128xf32>
    %25 = vector.broadcast %24 : vector<1x128xf32> to vector<2x128xf32>
    %26 = arith.addf %23, %25 : vector<2x128xf32>
    %cst_15 = arith.constant 0.000000e+00 : f32
    %27 = vector.broadcast %cst_15 : f32 to vector<2x128xf32>
    %28 = arith.maximumf %26, %27 : vector<2x128xf32>
    %c0_16 = arith.constant 0 : index
    %c0_17 = arith.constant 0 : index
    %29 = vector.load %arg8[%c0_16, %c0_17] : memref<2x128xf32, #tpu.memory_space<vmem>>, vector<2x128xf32>
    tpu.vector_store %arg8[%c0_16, %c0_17], %28 {strides = array<i32>} : memref<2x128xf32, #tpu.memory_space<vmem>>, vector<2x128xf32>,
    %30 = arith.truncf %28 : vector<2x128xf32> to vector<2x128xbf16>
    %c0_18 = arith.constant 0 : index
    %c0_19 = arith.constant 0 : index
    %31 = vector.load %arg6[%c0_18, %c0_19] : memref<128x128xbf16, #tpu.memory_space<vmem>>, vector<128x128xbf16>
    %cst_20 = arith.constant dense<0.000000e+00> : vector<2x128xf32>
    %32 = tpu.matmul %30, %31, %cst_20 {dimension_numbers = #tpu.dot_dimension_numbers<[1], [0], [0], [1], [0, 0, 1, 1], [], []>} : vector<2x128xbf16>, vector<128x128xbf16>, vector<2x128xf32> -> vector<2x128xf32>
    %c0_21 = arith.constant 0 : index
    %c0_22 = arith.constant 0 : index
    %33 = vector.load %arg7[%c0_21, %c0_22] : memref<1x128xf32, #tpu.memory_space<vmem>>, vector<1x128xf32>
    %34 = vector.broadcast %33 : vector<1x128xf32> to vector<2x128xf32>
    %35 = arith.addf %32, %34 : vector<2x128xf32>
    %c0_23 = arith.constant 0 : index
    %c0_24 = arith.constant 0 : index
    %36 = vector.load %arg9[%c0_23, %c0_24] : memref<2x128xf32, #tpu.memory_space<vmem>>, vector<2x128xf32>
    tpu.vector_store %arg9[%c0_23, %c0_24], %35 {strides = array<i32>} : memref<2x128xf32, #tpu.memory_space<vmem>>, vector<2x128xf32>,
    return
  }
  func.func @transform_0(%arg0: i32) -> (i32, i32) {
    %c0_i32 = arith.constant 0 : i32
    %c0_i32_0 = arith.constant 0 : i32
    return %arg0, %c0_i32 : i32, i32
  }
  func.func @transform_1(%arg0: i32) -> (i32, i32) {
    %c0_i32 = arith.constant 0 : i32
    %c0_i32_0 = arith.constant 0 : i32
    %c0_i32_1 = arith.constant 0 : i32
    return %c0_i32, %c0_i32_0 : i32, i32
  }
  func.func @transform_2(%arg0: i32) -> (i32, i32) {
    %c0_i32 = arith.constant 0 : i32
    %c0_i32_0 = arith.constant 0 : i32
    %c0_i32_1 = arith.constant 0 : i32
    return %c0_i32, %c0_i32_0 : i32, i32
  }
  func.func @transform_3(%arg0: i32) -> (i32, i32) {
    %c0_i32 = arith.constant 0 : i32
    %c0_i32_0 = arith.constant 0 : i32
    %c0_i32_1 = arith.constant 0 : i32
    return %c0_i32, %c0_i32_0 : i32, i32
  }
  func.func @transform_4(%arg0: i32) -> (i32, i32) {
    %c0_i32 = arith.constant 0 : i32
    %c0_i32_0 = arith.constant 0 : i32
    %c0_i32_1 = arith.constant 0 : i32
    return %c0_i32, %c0_i32_0 : i32, i32
  }
  func.func @transform_5(%arg0: i32) -> (i32, i32) {
    %c0_i32 = arith.constant 0 : i32
    %c0_i32_0 = arith.constant 0 : i32
    %c0_i32_1 = arith.constant 0 : i32
    return %c0_i32, %c0_i32_0 : i32, i32
  }
  func.func @transform_6(%arg0: i32) -> (i32, i32) {
    %c0_i32 = arith.constant 0 : i32
    %c0_i32_0 = arith.constant 0 : i32
    %c0_i32_1 = arith.constant 0 : i32
    return %c0_i32, %c0_i32_0 : i32, i32
  }
  func.func @transform_7(%arg0: i32) -> (i32, i32) {
    %c0_i32 = arith.constant 0 : i32
    %c0_i32_0 = arith.constant 0 : i32
    return %arg0, %c0_i32 : i32, i32
  }
  func.func @transform_8(%arg0: i32) -> (i32, i32) {
    %c0_i32 = arith.constant 0 : i32
    %c0_i32_0 = arith.constant 0 : i32
    return %arg0, %c0_i32 : i32, i32
  }
}

</mosaic_0001>

<bundles_post_ra>
// kernel: clustering_model_forward.1
= control target key start
LH: loop header
LB: loop body
LE: loop exit
PB: predicated region body
PF: predicated region fallthrough
CT: control target
= control target key end

     0   :  { %vm281_vm0 = vcmask 293888   ;;  %vm378_vm1 = vcmask 1041408   ;;  %s1894_s0 = inlined_call_operand.vmem [shape: bf16[512,36], index: 0, kind: input, shape index: {}]   ;;  %s1895_s1 = inlined_call_operand.vmem [shape: bf16[36,8], index: 1, kind: input, shape index: {}]   ;;  %s1896_s2 = inlined_call_operand.vmem [shape: f32[1,8], index: 2, kind: input, shape index: {}]   ;;  %s1897_s3 = inlined_call_operand.vmem [shape: bf16[8,128], index: 3, kind: input, shape index: {}]   ;;  %s1898_s4 = inlined_call_operand.vmem [shape: f32[1,128], index: 4, kind: input, shape index: {}]   ;;  %s1899_s5 = inlined_call_operand.vmem [shape: bf16[128,128], index: 5, kind: input, shape index: {}]   ;;  %s1900_s6 = inlined_call_operand.vmem [shape: f32[1,128], index: 6, kind: input, shape index: {}]   ;;  %s1901_s7 = inlined_call_operand.hbm [shape: f32[2,128], index: 7, kind: output, shape index: {0}]   ;;  %s1902_s8 = inlined_call_operand.vmem [shape: f32[2,128], index: 8, kind: output, shape index: {1}]  }
   0x1   :  { %v1454_v0 = vld [vmem:[%s1895_s1] sm:$0xff]   ;;  %v1455_v1 = vld [vmem:[%s1895_s1 + $0x8] sm:$0xff]   ;;  %v1456_v2 = vld [vmem:[%s1895_s1 + $0x10] ss:$0 sps:$4 sm:$0x33]  }
   0x2   :  { %1289 = vmatprep.subr.bf16.mxu0 %v1454_v0  ;;  %v1457_v3 = vld [vmem:[%s1894_s0] sm:$0xff]   ;;  %v380_v4 = vsel %vm378_vm1, %v1456_v2, 0  ;;  %v1458_v5 = vld [vmem:[%s1894_s0 + $0x8] sm:$0xff]   ;;  %v1459_v6 = vld [vmem:[%s1894_s0 + $0x10] sm:$0xff]  }
   0x3   :  { %1290 = vmatpush3.bf16.msra.mxu0 %v1454_v0  ;;  %1295 = vmatprep.mubr.msk.bf16.mxu0 %vm281_vm0, %v1457_v3  ;;  %v1460_v7 = vld [vmem:[%s1894_s0 + $0x18] sm:$0xff]   ;;  %v1461_v8 = vld [vmem:[%s1894_s0 + $0x20] sm:$0xff]   ;;  %v1462_v9 = vld [vmem:[%s1894_s0 + $0x28] sm:$0xff]  }
   0x4   :  { %1291 = vmatprep.subr.bf16.mxu0 %v1455_v1  ;;  %v1463_v10 = vld [vmem:[%s1894_s0 + $0x30] sm:$0xff]   ;;  %v1464_v11 = vld [vmem:[%s1894_s0 + $0x38] sm:$0xff]   ;;  %v1465_v12 = vld [vmem:[%s1894_s0 + $0x40] sm:$0xff]  }
   0x7   :  { %1292 = vmatpush3.bf16.msra.mxu0 %v1455_v1 }
   0x8   :  { %1449 = vmatprep.subr.msk.bf16.mxu0 %vm378_vm1, %v1456_v2 }
   0xb   :  { %1294 = vmatpush3.bf16.msra.mxu0 %v380_v4 }
   0xe   :  { %1296 = vmatmul.mubr.msk.bf16.vlgmr.msra.gmra.mrb[0].mxu0 %vm281_vm0, %v1458_v5 }
   0xf   :  { %1299 = vmatprep.mubr.msk.bf16.mxu0 %vm281_vm0, %v1459_v6 }
  0x16   :  { %1300 = vmatmul.mubr.msk.bf16.gmra.mrb[4].mxu0 %vm281_vm0, %v1460_v7 }
  0x17   :  { %1303 = vmatprep.mubr.msk.bf16.mxu0 %vm281_vm0, %v1461_v8 }
  0x1e   :  { %1304 = vmatmul.mubr.msk.bf16.gmra.mrb[8].mxu0 %vm281_vm0, %v1462_v9 }
  0x1f   :  { %1307 = vmatprep.mubr.msk.bf16.mxu0 %vm281_vm0, %v1463_v10 }
  0x26   :  { %1308 = vmatmul.mubr.msk.bf16.gmra.mrb[12].mxu0 %vm281_vm0, %v1464_v11 }
  0x27   :  { %1311 = vmatprep.mubr.msk.bf16.mxu0 %vm281_vm0, %v1465_v12 }
  0x28   :  { %14 = vsyncpa [#allocation3], 0  ;;  %v1466_v13 = vld [vmem:[%s1894_s0 + $0x48] sm:$0xff]   ;;  %v1467_v14 = vld [vmem:[%s1894_s0 + $0x50] sm:$0xff]   ;;  %v735_v36 = vlaneseq  ;;  %v1521_v42 = vmov 0.00390625   ;;  %vm913_vm14 = vcmask 1043456  }
  0x29   :  { %v1468_v15 = vld [vmem:[%s1894_s0 + $0x58] sm:$0xff]   ;;  %v1469_v16 = vld [vmem:[%s1894_s0 + $0x60] sm:$0xff]   ;;  %v1470_v17 = vld [vmem:[%s1894_s0 + $0x68] sm:$0xff]   ;;  %vm1523_vm15 = vmmov 0   ;;  %s1524_s24 = smov [#allocation2]  }
  0x2a   :  { %v1471_v18 = vld [vmem:[%s1894_s0 + $0x70] sm:$0xff]   ;;  %v1472_v19 = vld [vmem:[%s1894_s0 + $0x78] sm:$0xff]   ;;  %v1473_v20 = vld [vmem:[%s1894_s0 + $0x80] sm:$0xff]   ;;  %v741_v37 = vshrl.u32 %v735_v36, 7  ;;  %v736_v38 = vand.u32 127, %v735_v36  ;;  %s1078_s25 = sshll.u32 %s1524_s24, 4  ;;  %s1079_s25 = int_to_ptr.vmem [resolvable:$true] %s1078_s25 }
  0x2b   :  { %v1474_v21 = vld [vmem:[%s1894_s0 + $0x88] sm:$0xff]   ;;  %v1475_v22 = vld [vmem:[%s1894_s0 + $0x90] sm:$0xff]   ;;  %v1476_v23 = vld [vmem:[%s1894_s0 + $0x98] sm:$0xff]   ;;  %s1497_s26 = scalar_lea.vmem %s1079_s25, 32  ;;  %p1502_p1 = scmp.lt.s32.totalorder %s1079_s25, %s1079_s25 }
  0x2c   :  { %v1477_v24 = vld [vmem:[%s1894_s0 + $0xa0] sm:$0xff]   ;;  %v1478_v25 = vld [vmem:[%s1894_s0 + $0xa8] sm:$0xff]   ;;  %v1479_v26 = vld [vmem:[%s1894_s0 + $0xb0] sm:$0xff]   ;;  %v742_v39 = vmul.u32 256, %v741_v37  ;;  %v737_v40 = vadd.s32 128, %v736_v38  ;;  %v739_v55 = vadd.s32 384, %v736_v38  ;;  %p1498_p0 = scmp.ne.s32.totalorder %s1079_s25, %s1497_s26  ;;  %p1503_p2 = scmp.lt.s32.totalorder %s1497_s26, %s1497_s26 }
  0x2d   :  { %v1480_v27 = vld [vmem:[%s1894_s0 + $0xb8] sm:$0xff]   ;;  %v1481_v28 = vld [vmem:[%s1894_s0 + $0xc0] sm:$0xff]   ;;  %v1482_v29 = vld [vmem:[%s1894_s0 + $0xc8] sm:$0xff]   ;;  %v738_v58 = vadd.s32 256, %v736_v38 }
  0x2e   :  { %1312 = vmatmul.mubr.msk.bf16.gmra.mrb[16].mxu0 %vm281_vm0, %v1466_v13  ;;  %v1483_v30 = vld [vmem:[%s1894_s0 + $0xd0] sm:$0xff]   ;;  %v1484_v31 = vld [vmem:[%s1894_s0 + $0xd8] sm:$0xff]   ;;  %v1485_v32 = vld [vmem:[%s1894_s0 + $0xe0] sm:$0xff]   ;;  %v747_v41 = vadd.s32 256, %v742_v39  ;;  %vm744_vm2 = vcmp.ge.s32.totalorder %v737_v40, %v742_v39  ;;  %vm743_vm5 = vcmp.ge.s32.totalorder %v736_v38, %v742_v39  ;;  %vm746_vm8 = vcmp.ge.s32.totalorder %v739_v55, %v742_v39  ;;  %p1504_p3 = por %p1503_p2, %p1502_p1 }
  0x2f   :  { %1315 = vmatprep.mubr.msk.bf16.mxu0 %vm281_vm0, %v1467_v14  ;;  %v1486_v33 = vld [vmem:[%s1894_s0 + $0xe8] sm:$0xff]   ;;  %v1487_v34 = vld [vmem:[%s1894_s0 + $0xf0] sm:$0xff]   ;;  %v1488_v35 = vld [vmem:[%s1894_s0 + $0xf8] sm:$0xff]   ;;  %vm745_vm11 = vcmp.ge.s32.totalorder %v738_v58, %v742_v39 }
  0x30   :  { %vm749_vm3 = vcmp.lt.s32.totalorder %v737_v40, %v747_v41  ;;  %vm748_vm6 = vcmp.lt.s32.totalorder %v736_v38, %v747_v41  ;;  %v1715_v44 = vld [vmem:[%s1896_s2] ss:$0 sm:$0xff]  ;;  %vm751_vm9 = vcmp.lt.s32.totalorder %v739_v55, %v747_v41  ;;  %vm750_vm12 = vcmp.lt.s32.totalorder %v738_v58, %v747_v41  ;;  %p1505_p4 = pnand %p1504_p3, %p1498_p0 }
  0x31   :  { %vm753_vm4 = vmand %vm744_vm2, %vm749_vm3 }
  0x32   :  { %1158 = vmatprep.mubr.msk.f32.mxu1 %vm753_vm4, %v1521_v42  ;;  %vm1708_vm7 = vmand %vm743_vm5, %vm748_vm6 }
  0x33   :  { %vm1725_vm10 = vmand %vm746_vm8, %vm751_vm9 }
  0x34   :  { %vm1730_vm13 = vmand %vm745_vm11, %vm750_vm12 }
  0x36   :  { %1316 = vmatmul.mubr.msk.bf16.gmra.mrb[20].mxu0 %vm281_vm0, %v1468_v15 }
  0x37   :  { %1319 = vmatprep.mubr.msk.bf16.mxu0 %vm281_vm0, %v1469_v16 }
  0x3e   :  { %1320 = vmatmul.mubr.msk.bf16.gmra.mrb[24].mxu0 %vm281_vm0, %v1470_v17 }
  0x3f   :  { %1323 = vmatprep.mubr.msk.bf16.mxu0 %vm281_vm0, %v1471_v18 }
  0x46   :  { %1324 = vmatmul.mubr.msk.bf16.gmra.mrb[28].mxu0 %vm281_vm0, %v1472_v19 }
  0x47   :  { %1327 = vmatprep.mubr.msk.bf16.mxu0 %vm281_vm0, %v1473_v20 }
  0x4e   :  { %1328 = vmatmul.mubr.msk.bf16.gmra.mrb[32].mxu0 %vm281_vm0, %v1474_v21 }
  0x4f   :  { %1331 = vmatprep.mubr.msk.bf16.mxu0 %vm281_vm0, %v1475_v22 }
  0x56   :  { %1332 = vmatmul.mubr.msk.bf16.gmra.mrb[36].mxu0 %vm281_vm0, %v1476_v23 }
  0x57   :  { %1335 = vmatprep.mubr.msk.bf16.mxu0 %vm281_vm0, %v1477_v24 }
  0x5e   :  { %1336 = vmatmul.mubr.msk.bf16.gmra.mrb[40].mxu0 %vm281_vm0, %v1478_v25 }
  0x5f   :  { %1339 = vmatprep.mubr.msk.bf16.mxu0 %vm281_vm0, %v1479_v26 }
  0x66   :  { %1340 = vmatmul.mubr.msk.bf16.gmra.mrb[44].mxu0 %vm281_vm0, %v1480_v27 }
  0x67   :  { %1343 = vmatprep.mubr.msk.bf16.mxu0 %vm281_vm0, %v1481_v28 }
  0x6e   :  { %1344 = vmatmul.mubr.msk.bf16.gmra.mrb[48].mxu0 %vm281_vm0, %v1482_v29 }
  0x6f   :  { %1347 = vmatprep.mubr.msk.bf16.mxu0 %vm281_vm0, %v1483_v30 }
  0x76   :  { %1348 = vmatmul.mubr.msk.bf16.gmra.mrb[52].mxu0 %vm281_vm0, %v1484_v31 }
  0x77   :  { %1351 = vmatprep.mubr.msk.bf16.mxu0 %vm281_vm0, %v1485_v32 }
  0x7e   :  { %1352 = vmatmul.mubr.msk.bf16.gmra.mrb[56].mxu0 %vm281_vm0, %v1486_v33 }
  0x7f   :  { %1355 = vmatprep.mubr.msk.bf16.mxu0 %vm281_vm0, %v1487_v34 }
  0x86   :  { %1356 = vmatmul.mubr.msk.bf16.gmra.mrb[60].mxu0 %vm281_vm0, %v1488_v35  ;;  %vm909_vm0 = vcmask 64512  }
  0xe1   :  { %v1297_v45 = vpop.f32.mrb[0].mxu0 }
  0xe2   :  { %v425_v46 = vadd.f32 %v1297_v45, %v1715_v44  ;;  %v416_v47 = vpop.f32.mrb[1].mxu0 }
  0xe3   :  { %v417_v48 = vadd.f32 %v1715_v44, %v416_v47  ;;  %v1298_v49 = vpop.f32.mrb[2].mxu0 }
  0xe4   :  { %v428_v50 = vadd.f32 %v1298_v49, %v1715_v44  ;;  %v419_v51 = vpop.f32.mrb[3].mxu0  ;;  %v673_v53 = vmax.f32 %v425_v46, 0.0 }
  0xe5   :  { %v420_v52 = vadd.f32 %v1715_v44, %v419_v51  ;;  %v671_v56 = vmax.f32 %v417_v48, 0.0 }
  0xe6   :  { %v674_v54 = vmax.f32 %v428_v50, 0.0 }
  0xe7   :  { %v672_v57 = vmax.f32 %v420_v52, 0.0 }
  0xe8   :  { %v1721_v59 = vpack.c.bf16 %v674_v54, %v673_v53 }
  0xe9   :  { %v1301_v60 = vpop.f32.mrb[4].mxu0  ;;  %v1723_v61 = vpack.c.bf16 %v672_v57, %v671_v56 }
  0xea   :  { %v441_v63 = vadd.f32 %v1301_v60, %v1715_v44  ;;  %v432_v0 = vpop.f32.mrb[5].mxu0 }
  0xeb   :  { %v433_v2 = vadd.f32 %v1715_v44, %v432_v0  ;;  %v1302_v3 = vpop.f32.mrb[6].mxu0 }
  0xec   :  { %v444_v4 = vadd.f32 %v1302_v3, %v1715_v44  ;;  %v435_v5 = vpop.f32.mrb[7].mxu0  ;;  %v677_v7 = vmax.f32 %v441_v63, 0.0 }
  0xed   :  { %v436_v6 = vadd.f32 %v1715_v44, %v435_v5  ;;  %v675_v9 = vmax.f32 %v433_v2, 0.0 }
  0xee   :  { %v678_v8 = vmax.f32 %v444_v4, 0.0 }
  0xef   :  { %v676_v10 = vmax.f32 %v436_v6, 0.0 }
  0xf0   :  { %v1737_v11 = vpack.c.bf16 %v678_v8, %v677_v7 }
  0xf1   :  { %v1739_v12 = vpack.c.bf16 %v676_v10, %v675_v9  ;;  %v1305_v13 = vpop.f32.mrb[8].mxu0 }
  0xf2   :  { %v457_v14 = vadd.f32 %v1305_v13, %v1715_v44  ;;  %v448_v15 = vpop.f32.mrb[9].mxu0 }
  0xf3   :  { %v449_v16 = vadd.f32 %v1715_v44, %v448_v15  ;;  %v1306_v17 = vpop.f32.mrb[10].mxu0 }
  0xf4   :  { %v460_v18 = vadd.f32 %v1306_v17, %v1715_v44  ;;  %v451_v19 = vpop.f32.mrb[11].mxu0  ;;  %v681_v21 = vmax.f32 %v457_v14, 0.0 }
  0xf5   :  { %v452_v20 = vadd.f32 %v1715_v44, %v451_v19  ;;  %v679_v23 = vmax.f32 %v449_v16, 0.0 }
  0xf6   :  { %v682_v22 = vmax.f32 %v460_v18, 0.0 }
  0xf7   :  { %v680_v24 = vmax.f32 %v452_v20, 0.0 }
  0xf8   :  { %v1745_v25 = vpack.c.bf16 %v682_v22, %v681_v21 }
  0xf9   :  { %v1747_v26 = vpack.c.bf16 %v680_v24, %v679_v23  ;;  %v1309_v27 = vpop.f32.mrb[12].mxu0 }
  0xfa   :  { %v473_v28 = vadd.f32 %v1309_v27, %v1715_v44  ;;  %v464_v29 = vpop.f32.mrb[13].mxu0 }
  0xfb   :  { %v465_v30 = vadd.f32 %v1715_v44, %v464_v29  ;;  %v1310_v31 = vpop.f32.mrb[14].mxu0 }
  0xfc   :  { %v476_v32 = vadd.f32 %v1310_v31, %v1715_v44  ;;  %v467_v33 = vpop.f32.mrb[15].mxu0  ;;  %v685_v35 = vmax.f32 %v473_v28, 0.0 }
  0xfd   :  { %v468_v34 = vadd.f32 %v1715_v44, %v467_v33  ;;  %v683_v37 = vmax.f32 %v465_v30, 0.0 }
  0xfe   :  { %v686_v36 = vmax.f32 %v476_v32, 0.0 }
  0xff   :  { %v684_v38 = vmax.f32 %v468_v34, 0.0 }
 0x100   :  { %v1753_v39 = vpack.c.bf16 %v686_v36, %v685_v35 }
 0x101   :  { %v1755_v40 = vpack.c.bf16 %v684_v38, %v683_v37  ;;  %v1313_v41 = vpop.f32.mrb[16].mxu0 }
 0x102   :  { %v489_v45 = vadd.f32 %v1313_v41, %v1715_v44  ;;  %v480_v46 = vpop.f32.mrb[17].mxu0 }
 0x103   :  { %v481_v47 = vadd.f32 %v1715_v44, %v480_v46  ;;  %v1314_v48 = vpop.f32.mrb[18].mxu0 }
 0x104   :  { %v492_v49 = vadd.f32 %v1314_v48, %v1715_v44  ;;  %v483_v50 = vpop.f32.mrb[19].mxu0  ;;  %v689_v52 = vmax.f32 %v489_v45, 0.0 }
 0x105   :  { %v484_v51 = vadd.f32 %v1715_v44, %v483_v50  ;;  %v687_v54 = vmax.f32 %v481_v47, 0.0 }
 0x106   :  { %v690_v53 = vmax.f32 %v492_v49, 0.0 }
 0x107   :  { %v688_v55 = vmax.f32 %v484_v51, 0.0 }
 0x108   :  { %v1389_v56 = vpack.c.bf16 %v690_v53, %v689_v52 }
 0x109   :  { %v1317_v57 = vpop.f32.mrb[20].mxu0  ;;  %v1385_v58 = vpack.c.bf16 %v688_v55, %v687_v54 }
 0x10a   :  { %v505_v60 = vadd.f32 %v1317_v57, %v1715_v44  ;;  %v496_v63 = vpop.f32.mrb[21].mxu0 }
 0x10b   :  { %v497_v0 = vadd.f32 %v1715_v44, %v496_v63  ;;  %v1318_v2 = vpop.f32.mrb[22].mxu0  ;;  %1386 = vmatprep.subr.bf16.mxu1 %v1385_v58 }
 0x10c   :  { %v508_v3 = vadd.f32 %v1318_v2, %v1715_v44  ;;  %v499_v4 = vpop.f32.mrb[23].mxu0  ;;  %1388 = vmatpush3.bf16.msra.mxu1 %v1723_v61  ;;  %v693_v6 = vmax.f32 %v505_v60, 0.0 }
 0x10d   :  { %v500_v5 = vadd.f32 %v1715_v44, %v499_v4  ;;  %1390 = vmatprep.subr.bf16.mxu1 %v1389_v56  ;;  %v691_v8 = vmax.f32 %v497_v0, 0.0 }
 0x10e   :  { %v694_v7 = vmax.f32 %v508_v3, 0.0 }
 0x10f   :  { %v692_v9 = vmax.f32 %v500_v5, 0.0 }
 0x110   :  { %v1397_v10 = vpack.c.bf16 %v694_v7, %v693_v6  ;;  %1392 = vmatpush3.bf16.msra.mxu1 %v1721_v59 }
 0x111   :  { %v1393_v13 = vpack.c.bf16 %v692_v9, %v691_v8  ;;  %v1321_v14 = vpop.f32.mrb[24].mxu0 }
 0x112   :  { %v521_v15 = vadd.f32 %v1321_v14, %v1715_v44  ;;  %v512_v16 = vpop.f32.mrb[25].mxu0 }
 0x113   :  { %v513_v17 = vadd.f32 %v1715_v44, %v512_v16  ;;  %v1322_v18 = vpop.f32.mrb[26].mxu0  ;;  %1394 = vmatprep.subr.bf16.mxu1 %v1393_v13 }
 0x114   :  { %v524_v61 = vadd.f32 %v1322_v18, %v1715_v44  ;;  %v515_v19 = vpop.f32.mrb[27].mxu0  ;;  %1396 = vmatpush3.bf16.msra.mxu1 %v1739_v12  ;;  %v697_v21 = vmax.f32 %v521_v15, 0.0 }
 0x115   :  { %v516_v20 = vadd.f32 %v1715_v44, %v515_v19  ;;  %1398 = vmatprep.subr.bf16.mxu1 %v1397_v10  ;;  %v695_v59 = vmax.f32 %v513_v17, 0.0 }
 0x116   :  { %v698_v22 = vmax.f32 %v524_v61, 0.0 }
 0x117   :  { %v696_v23 = vmax.f32 %v516_v20, 0.0 }
 0x118   :  { %v1405_v24 = vpack.c.bf16 %v698_v22, %v697_v21  ;;  %1400 = vmatpush3.bf16.msra.mxu1 %v1737_v11 }
 0x119   :  { %v1401_v27 = vpack.c.bf16 %v696_v23, %v695_v59  ;;  %v1325_v28 = vpop.f32.mrb[28].mxu0 }
 0x11a   :  { %v537_v29 = vadd.f32 %v1325_v28, %v1715_v44  ;;  %v528_v30 = vpop.f32.mrb[29].mxu0 }
 0x11b   :  { %v529_v31 = vadd.f32 %v1715_v44, %v528_v30  ;;  %v1326_v32 = vpop.f32.mrb[30].mxu0  ;;  %1402 = vmatprep.subr.bf16.mxu1 %v1401_v27 }
 0x11c   :  { %v540_v12 = vadd.f32 %v1326_v32, %v1715_v44  ;;  %v531_v33 = vpop.f32.mrb[31].mxu0  ;;  %1404 = vmatpush3.bf16.msra.mxu1 %v1747_v26  ;;  %v701_v35 = vmax.f32 %v537_v29, 0.0 }
 0x11d   :  { %v532_v34 = vadd.f32 %v1715_v44, %v531_v33  ;;  %1406 = vmatprep.subr.bf16.mxu1 %v1405_v24  ;;  %v699_v11 = vmax.f32 %v529_v31, 0.0 }
 0x11e   :  { %v702_v36 = vmax.f32 %v540_v12, 0.0 }
 0x11f   :  { %v700_v37 = vmax.f32 %v532_v34, 0.0 }
 0x120   :  { %v1413_v38 = vpack.c.bf16 %v702_v36, %v701_v35  ;;  %1408 = vmatpush3.bf16.msra.mxu1 %v1745_v25 }
 0x121   :  { %v1409_v41 = vpack.c.bf16 %v700_v37, %v699_v11  ;;  %v1329_v45 = vpop.f32.mrb[32].mxu0 }
 0x122   :  { %v553_v46 = vadd.f32 %v1329_v45, %v1715_v44  ;;  %v544_v47 = vpop.f32.mrb[33].mxu0 }
 0x123   :  { %v545_v48 = vadd.f32 %v1715_v44, %v544_v47  ;;  %v1330_v49 = vpop.f32.mrb[34].mxu0  ;;  %1410 = vmatprep.subr.bf16.mxu1 %v1409_v41 }
 0x124   :  { %v556_v26 = vadd.f32 %v1330_v49, %v1715_v44  ;;  %v547_v50 = vpop.f32.mrb[35].mxu0  ;;  %1412 = vmatpush3.bf16.msra.mxu1 %v1755_v40  ;;  %v705_v52 = vmax.f32 %v553_v46, 0.0 }
 0x125   :  { %v548_v51 = vadd.f32 %v1715_v44, %v547_v50  ;;  %1414 = vmatprep.subr.bf16.mxu1 %v1413_v38  ;;  %v703_v25 = vmax.f32 %v545_v48, 0.0 }
 0x126   :  { %v706_v53 = vmax.f32 %v556_v26, 0.0 }
 0x127   :  { %v704_v54 = vmax.f32 %v548_v51, 0.0 }
 0x128   :  { %v1784_v55 = vpack.c.bf16 %v706_v53, %v705_v52  ;;  %1416 = vmatpush3.bf16.msra.mxu1 %v1753_v39 }
 0x129   :  { %v1787_v56 = vpack.c.bf16 %v704_v54, %v703_v25  ;;  %v1333_v57 = vpop.f32.mrb[36].mxu0 }
 0x12a   :  { %v569_v58 = vadd.f32 %v1333_v57, %v1715_v44  ;;  %v560_v60 = vpop.f32.mrb[37].mxu0 }
 0x12b   :  { %v561_v63 = vadd.f32 %v1715_v44, %v560_v60  ;;  %v1334_v40 = vpop.f32.mrb[38].mxu0  ;;  %1159 = vmatmul.mubr.msk.f32.vlgmr.msra.gmra.mrb[0].mxu1 %vm1708_vm7, %v1521_v42 }
 0x12c   :  { %v572_v0 = vadd.f32 %v1334_v40, %v1715_v44  ;;  %v563_v2 = vpop.f32.mrb[39].mxu0  ;;  %1160 = vmatprep.mubr.msk.f32.mxu1 %vm1725_vm10, %v1521_v42  ;;  %v709_v3 = vmax.f32 %v569_v58, 0.0 }
 0x12d   :  { %v564_v39 = vadd.f32 %v1715_v44, %v563_v2  ;;  %v707_v5 = vmax.f32 %v561_v63, 0.0 }
 0x12e   :  { %v710_v4 = vmax.f32 %v572_v0, 0.0 }
 0x12f   :  { %v708_v6 = vmax.f32 %v564_v39, 0.0 }
 0x130   :  { %v1799_v7 = vpack.c.bf16 %v710_v4, %v709_v3 }
 0x131   :  { %v1801_v8 = vpack.c.bf16 %v708_v6, %v707_v5  ;;  %v1337_v9 = vpop.f32.mrb[40].mxu0 }
 0x132   :  { %v585_v43 = vadd.f32 %v1337_v9, %v1715_v44  ;;  %v576_v10 = vpop.f32.mrb[41].mxu0 }
 0x133   :  { %v577_v13 = vadd.f32 %v1715_v44, %v576_v10  ;;  %v1338_v14 = vpop.f32.mrb[42].mxu0 }
 0x134   :  { %v588_v62 = vadd.f32 %v1338_v14, %v1715_v44  ;;  %v579_v15 = vpop.f32.mrb[43].mxu0  ;;  %v713_v17 = vmax.f32 %v585_v43, 0.0 }
 0x135   :  { %v580_v16 = vadd.f32 %v1715_v44, %v579_v15  ;;  %v711_v61 = vmax.f32 %v577_v13, 0.0 }
 0x136   :  { %v714_v18 = vmax.f32 %v588_v62, 0.0 }
 0x137   :  { %v712_v19 = vmax.f32 %v580_v16, 0.0 }
 0x138   :  { %v1807_v20 = vpack.c.bf16 %v714_v18, %v713_v17 }
 0x139   :  { %v1809_v21 = vpack.c.bf16 %v712_v19, %v711_v61  ;;  %v1341_v22 = vpop.f32.mrb[44].mxu0 }
 0x13a   :  { %v601_v59 = vadd.f32 %v1341_v22, %v1715_v44  ;;  %v592_v23 = vpop.f32.mrb[45].mxu0 }
 0x13b   :  { %v593_v24 = vadd.f32 %v1715_v44, %v592_v23  ;;  %v1342_v27 = vpop.f32.mrb[46].mxu0 }
 0x13c   :  { %v604_v28 = vadd.f32 %v1342_v27, %v1715_v44  ;;  %v595_v29 = vpop.f32.mrb[47].mxu0  ;;  %v717_v31 = vmax.f32 %v601_v59, 0.0 }
 0x13d   :  { %v596_v30 = vadd.f32 %v1715_v44, %v595_v29  ;;  %v715_v12 = vmax.f32 %v593_v24, 0.0 }
 0x13e   :  { %v718_v32 = vmax.f32 %v604_v28, 0.0 }
 0x13f   :  { %v716_v33 = vmax.f32 %v596_v30, 0.0 }
 0x140   :  { %v1815_v34 = vpack.c.bf16 %v718_v32, %v717_v31 }
 0x141   :  { %v1817_v35 = vpack.c.bf16 %v716_v33, %v715_v12  ;;  %v1345_v36 = vpop.f32.mrb[48].mxu0 }
 0x142   :  { %v617_v11 = vadd.f32 %v1345_v36, %v1715_v44  ;;  %v608_v37 = vpop.f32.mrb[49].mxu0 }
 0x143   :  { %v609_v38 = vadd.f32 %v1715_v44, %v608_v37  ;;  %v1346_v41 = vpop.f32.mrb[50].mxu0 }
 0x144   :  { %v620_v45 = vadd.f32 %v1346_v41, %v1715_v44  ;;  %v611_v46 = vpop.f32.mrb[51].mxu0  ;;  %v721_v48 = vmax.f32 %v617_v11, 0.0  ;;  %v1490_v41 = vld [vmem:[%s1899_s5 + $0x8] sm:$0xff]  }
 0x145   :  { %v612_v47 = vadd.f32 %v1715_v44, %v611_v46  ;;  %v719_v26 = vmax.f32 %v609_v38, 0.0  ;;  %v1492_v46 = vld [vmem:[%s1899_s5 + $0x18] sm:$0xff]  }
 0x146   :  { %v722_v49 = vmax.f32 %v620_v45, 0.0  ;;  %v1491_v45 = vld [vmem:[%s1899_s5 + $0x10] sm:$0xff]  }
 0x147   :  { %v720_v50 = vmax.f32 %v612_v47, 0.0  ;;  %v1493_v47 = vld [vmem:[%s1899_s5 + $0x20] sm:$0xff]  }
 0x148   :  { %v1421_v51 = vpack.c.bf16 %v722_v49, %v721_v48  ;;  %v1494_v48 = vld [vmem:[%s1899_s5 + $0x28] sm:$0xff]   ;;  %v1495_v49 = vld [vmem:[%s1899_s5 + $0x30] sm:$0xff]  }
 0x149   :  { %v1417_v52 = vpack.c.bf16 %v720_v50, %v719_v26  ;;  %v1349_v53 = vpop.f32.mrb[52].mxu0  ;;  %v1496_v26 = vld [vmem:[%s1899_s5 + $0x38] sm:$0xff]   ;;  %v1162_v50 = vld [vmem:[%s1898_s4] ss:$0 sm:$0xff] }
 0x14a   :  { %v633_v25 = vadd.f32 %v1349_v53, %v1715_v44  ;;  %v624_v54 = vpop.f32.mrb[53].mxu0 }
 0x14b   :  { %v625_v57 = vadd.f32 %v1715_v44, %v624_v54  ;;  %v1350_v58 = vpop.f32.mrb[54].mxu0  ;;  %1418 = vmatprep.subr.bf16.mxu1 %v1417_v52 }
 0x14c   :  { %v636_v60 = vadd.f32 %v1350_v58, %v1715_v44  ;;  %v627_v63 = vpop.f32.mrb[55].mxu0  ;;  %1420 = vmatpush3.bf16.msra.mxu1 %v1787_v56  ;;  %v725_v0 = vmax.f32 %v633_v25, 0.0 }
 0x14d   :  { %v628_v40 = vadd.f32 %v1715_v44, %v627_v63  ;;  %1422 = vmatprep.subr.bf16.mxu1 %v1421_v51  ;;  %v723_v39 = vmax.f32 %v625_v57, 0.0 }
 0x14e   :  { %v726_v2 = vmax.f32 %v636_v60, 0.0 }
 0x14f   :  { %v724_v3 = vmax.f32 %v628_v40, 0.0 }
 0x150   :  { %v1429_v4 = vpack.c.bf16 %v726_v2, %v725_v0  ;;  %1424 = vmatpush3.bf16.msra.mxu1 %v1784_v55 }
 0x151   :  { %v1425_v5 = vpack.c.bf16 %v724_v3, %v723_v39  ;;  %v1353_v6 = vpop.f32.mrb[56].mxu0 }
 0x152   :  { %v649_v9 = vadd.f32 %v1353_v6, %v1715_v44  ;;  %v640_v43 = vpop.f32.mrb[57].mxu0 }
 0x153   :  { %v641_v10 = vadd.f32 %v1715_v44, %v640_v43  ;;  %v1354_v13 = vpop.f32.mrb[58].mxu0  ;;  %1426 = vmatprep.subr.bf16.mxu1 %v1425_v5 }
 0x154   :  { %v652_v56 = vadd.f32 %v1354_v13, %v1715_v44  ;;  %v643_v14 = vpop.f32.mrb[59].mxu0  ;;  %1428 = vmatpush3.bf16.msra.mxu1 %v1801_v8  ;;  %v729_v15 = vmax.f32 %v649_v9, 0.0 }
 0x155   :  { %v644_v62 = vadd.f32 %v1715_v44, %v643_v14  ;;  %1430 = vmatprep.subr.bf16.mxu1 %v1429_v4  ;;  %v727_v55 = vmax.f32 %v641_v10, 0.0 }
 0x156   :  { %v730_v16 = vmax.f32 %v652_v56, 0.0 }
 0x157   :  { %v728_v17 = vmax.f32 %v644_v62, 0.0 }
 0x158   :  { %v1437_v18 = vpack.c.bf16 %v730_v16, %v729_v15  ;;  %1432 = vmatpush3.bf16.msra.mxu1 %v1799_v7 }
 0x159   :  { %v1433_v61 = vpack.c.bf16 %v728_v17, %v727_v55  ;;  %v1357_v19 = vpop.f32.mrb[60].mxu0 }
 0x15a   :  { %v665_v22 = vadd.f32 %v1357_v19, %v1715_v44  ;;  %v656_v59 = vpop.f32.mrb[61].mxu0 }
 0x15b   :  { %v657_v23 = vadd.f32 %v1715_v44, %v656_v59  ;;  %v1358_v24 = vpop.f32.mrb[62].mxu0  ;;  %1434 = vmatprep.subr.bf16.mxu1 %v1433_v61 }
 0x15c   :  { %v668_v8 = vadd.f32 %v1358_v24, %v1715_v44  ;;  %v659_v27 = vpop.f32.mrb[63].mxu0  ;;  %1436 = vmatpush3.bf16.msra.mxu1 %v1809_v21  ;;  %v733_v29 = vmax.f32 %v665_v22, 0.0  ;;  %v1522_v21 = vmov 0.0  }
 0x15d   :  { %v660_v28 = vadd.f32 %v1715_v44, %v659_v27  ;;  %1438 = vmatprep.subr.bf16.mxu1 %v1437_v18  ;;  %v731_v7 = vmax.f32 %v657_v23, 0.0  ;;  %v901_v44 = vld [vmem:[%s1897_s3] sm:$0xf] }
 0x15e   :  { %v734_v30 = vmax.f32 %v668_v8, 0.0  ;;  %v915_v33 = vsel %vm913_vm14, %v901_v44, 0 }
 0x15f   :  { %v732_v31 = vmax.f32 %v660_v28, 0.0 }
 0x160   :  { %v1445_v32 = vpack.c.bf16 %v734_v30, %v733_v29  ;;  %1440 = vmatpush3.bf16.msra.mxu1 %v1807_v20 }
 0x161   :  { %v1441_v12 = vpack.c.bf16 %v732_v31, %v731_v7 }
 0x163   :  { %1442 = vmatprep.subr.bf16.mxu1 %v1441_v12 }
 0x164   :  { %1444 = vmatpush3.bf16.msra.mxu1 %v1817_v35 }
 0x165   :  { %1446 = vmatprep.subr.bf16.mxu1 %v1445_v32 }
 0x168   :  { %1448 = vmatpush3.bf16.msra.mxu1 %v1815_v34 }
 0x169   :  { %1359 = vmatprep.subr.bf16.mxu1 %v1522_v21 }
 0x16b   :  { %1161 = vmatmul.mubr.msk.f32.vlgmr.msra.gmra.mrb[2].mxu1 %vm1730_vm13, %v1521_v42  ;;  %v1489_v42 = vld [vmem:[%s1899_s5] sm:$0xff]  }
 0x16c   :  { %1360 = vmatpush3.bf16.msra.mxu1 %v915_v33  ;;  %1361 = vmatprep.mubr.msk.bf16.mxu1 %vm1523_vm15, %v1522_v21 }
 0x16d   :  { %1365 = vmatprep.subr.bf16.mxu1 %v1522_v21 }
 0x1fe   :  { %v1240_v20 = vpop.f32.mrb[0].mxu1 }
 0x1ff   :  { %v1241_v35 = vpop.f32.mrb[1].mxu1 }
 0x200   :  { %v1242_v36 = vadd.f32 %v1241_v35, %v1240_v20 }
 0x23e   :  { %v1275_v34 = vpop.f32.mrb[2].mxu1 }
 0x23f   :  { %v1276_v11 = vpop.f32.mrb[3].mxu1 }
 0x240   :  { %v1277_v37 = vadd.f32 %v1276_v11, %v1275_v34 }
 0x242   :  { %v897_v1 = vadd.f32 %v1277_v37, %v1242_v36 }
 0x244   :  { %v900_v38 = vpack.c.bf16 %v897_v1, %v897_v1 }
 0x246   :  { %1362 = vmatmul.mubr.msk.bf16.vlgmr.msra.gmra.mrb[4].mxu1 %vm909_vm0, %v900_v38 }
 0x247   :  { %1366 = vmatpush3.bf16.msra.mxu1 %v1489_v42  ;;  %1381 = vmatprep.mubr.msk.bf16.mxu1 %vm1523_vm15, %v1522_v21 }
 0x248   :  { %1367 = vmatprep.subr.bf16.mxu1 %v1522_v21 }
 0x24b   :  { %1368 = vmatpush3.bf16.msra.mxu1 %v1490_v41 }
 0x24c   :  { %1369 = vmatprep.subr.bf16.mxu1 %v1522_v21 }
 0x24f   :  { %1370 = vmatpush3.bf16.msra.mxu1 %v1491_v45 }
 0x250   :  { %1371 = vmatprep.subr.bf16.mxu1 %v1522_v21 }
 0x253   :  { %1372 = vmatpush3.bf16.msra.mxu1 %v1492_v46 }
 0x254   :  { %1373 = vmatprep.subr.bf16.mxu1 %v1522_v21 }
 0x257   :  { %1374 = vmatpush3.bf16.msra.mxu1 %v1493_v47 }
 0x258   :  { %1375 = vmatprep.subr.bf16.mxu1 %v1522_v21 }
 0x25b   :  { %1376 = vmatpush3.bf16.msra.mxu1 %v1494_v48 }
 0x25c   :  { %1377 = vmatprep.subr.bf16.mxu1 %v1522_v21 }
 0x25f   :  { %1378 = vmatpush3.bf16.msra.mxu1 %v1495_v49 }
 0x260   :  { %1379 = vmatprep.subr.bf16.mxu1 %v1522_v21 }
 0x263   :  { %1380 = vmatpush3.bf16.msra.mxu1 %v1496_v26 }
 0x319   :  { %v951_v51 = vpop.f32.mrb[4].mxu1 }
 0x31a   :  { %v952_v52 = vadd.f32 %v1162_v50, %v951_v51  ;;  %v1363_v53 = vpop.f32.mrb[5].mxu1 }
 0x31b   :  { %v954_v25 = vpop.f32.mrb[6].mxu1 }
 0x31c   :  { %v957_v54 = vmax.f32 %v952_v52, 0.0  ;;  %v1364_v57 = vpop.f32.mrb[7].mxu1 }
 0x31e   :  { %v959_v58 = vpack.c.bf16 %v957_v54, %v957_v54  ;;  %958 = vst [vmem:[#allocation2] sm:$0x3] %v957_v54 }
 0x320   :  { %1382 = vmatmul.mubr.bf16.vlgmr.msra.gmra.mrb[8].mxu1 %v959_v58 }
 0x321   :  { %1508 = shalt.err (!%p1505_p4)
}
 0x322   :  { %s1509_s27 = scalar_lea.hbm %s1901_s7, 32 }
 0x323   :  { %p1510_p5 = scmp.ne.s32.totalorder %s1901_s7, %s1509_s27  ;;  %p1513_p6 = scmp.lt.u32.totalorder %s1509_s27, %s1901_s7 }
 0x325   :  { %p1515_p7 = pnand %p1513_p6, %p1510_p5 }
 0x327   :  { %1518 = shalt.err (!%p1515_p7)
}
 0x328   :  { %1081 = dma.vmem_to_hbm [thread:$0]  %s1079_s25, 32, %s1901_s7, [#allocation3]   ;;  %v1164_v60 = vld [vmem:[%s1900_s6] ss:$0 sm:$0xff] }
 0x3f3   :  { %v1065_v63 = vpop.f32.mrb[8].mxu1 }
 0x3f4   :  { %v1066_v40 = vadd.f32 %v1164_v60, %v1065_v63  ;;  %v1383_v0 = vpop.f32.mrb[9].mxu1 }
 0x3f5   :  { %v1068_v2 = vpop.f32.mrb[10].mxu1 }
 0x3f6   :  { %1071 = vst [vmem:[%s1902_s8] sm:$0x3] %v1066_v40  ;;  %v1384_v39 = vpop.f32.mrb[11].mxu1 }
 0x3f7   :  { %1519 = dma.done.wait [#allocation3], 32  }
 0x3f8   :  { %1520 = vsyncadd [#allocation3], 4294967264 }
 0x3f9   :  { %1089 = vsyncpa [#allocation3], 1 }

</bundles_post_ra>
